<compile_context>
chip_gen: v7x
topology: tpu7x:2x2x1
jax: 0.10.0
libtpu: 0.0.40
codegen_flags: <defaults>
</compile_context>

<pallas_src>
import jax
import jax.numpy as jnp
from jax import lax
from jax.experimental import pallas as pl
from jax.experimental.pallas import tpu as pltpu


def _fused_kernel(xs_ref, w1t_ref, b1_ref, x_ref, w2_ref, g_ref, b_ref, out_ref):
    # --- SE branch: 1x1 conv (24 -> 72) + bias + Hardsigmoid, as a [1,72] row --
    # z[0,c] = sum_k w1t[k,c] * xs[k,0] + b1[0,c]   (VPU multiply + sublane reduce)
    z = jnp.sum(w1t_ref[...] * xs_ref[...], axis=0, keepdims=True) + b1_ref[...]  # [1,72]
    s_row = jnp.clip(z * (1.0 / 6.0) + 0.5, 0.0, 1.0)   # Hardsigmoid = relu6(x+3)/6

    # --- fold the channel gate into the conv weight (5-vreg multiply) ----------
    w2s = w2_ref[...] * s_row                                                     # [40,72]

    # --- 1x1 conv (72 -> 40) as [40,72] @ [72,784] (lane-dense output) ---------
    y = jnp.dot(w2s, x_ref[...], preferred_element_type=jnp.float32)              # [40,784]

    # --- BatchNorm2d, training-mode biased batch stats (shifted two-pass) ------
    inv_r = 1.0 / y.shape[1]
    mean = jnp.sum(y, axis=1, keepdims=True) * inv_r                              # [40,1]
    diff = y - mean                                                               # [40,784]
    var = jnp.sum(diff * diff, axis=1, keepdims=True) * inv_r                     # [40,1]
    inv_std = lax.rsqrt(var + 1e-3)
    scale = g_ref[...] * inv_std                                                  # [40,1]
    out_ref[...] = diff * scale + b_ref[...]                                      # [40,784]


def fused_forward(x35, x32, w1, b1, w2, gamma, beta):
    """x35: [1,24,1,1], x32: [1,72,H,W] (NCHW).
    w1: [72,24] (PyTorch conv weight, 1x1 squeezed), b1: [72],
    w2: [40,72] (PyTorch conv weight, 1x1 squeezed), gamma/beta: [40].
    Returns [1,40,H,W] (NCHW)."""
    N, Cse, _, _ = x35.shape
    _, Cmid, H, W = x32.shape
    Cout = w2.shape[0]
    assert N == 1, "SE gating + flattened-R BN path assumes batch=1 (as in the module)"
    R = H * W

    # Free reshapes: NCHW with N=1 is already contiguous as [C, H*W].
    xs_col = x35.reshape(Cse, 1).astype(jnp.float32)        # [24, 1]
    x_mat = x32.reshape(Cmid, R).astype(jnp.float32)        # [72, 784]
    w1t = jnp.transpose(w1).astype(jnp.float32)             # [24, 72] (tiny, done by XLA)

    out = pl.pallas_call(
        _fused_kernel,
        out_shape=jax.ShapeDtypeStruct((Cout, R), jnp.float32),
        grid=(1,),
        in_specs=[
            pl.BlockSpec((Cse, 1), lambda i: (0, 0)),        # xs      [24,1]
            pl.BlockSpec((Cse, Cmid), lambda i: (0, 0)),     # w1^T    [24,72]
            pl.BlockSpec((1, Cmid), lambda i: (0, 0)),       # b1      [1,72]
            pl.BlockSpec((Cmid, R), lambda i: (0, 0)),       # x       [72,784]
            pl.BlockSpec((Cout, Cmid), lambda i: (0, 0)),    # w2      [40,72]
            pl.BlockSpec((Cout, 1), lambda i: (0, 0)),       # gamma   [40,1]
            pl.BlockSpec((Cout, 1), lambda i: (0, 0)),       # beta    [40,1]
        ],
        out_specs=pl.BlockSpec((Cout, R), lambda i: (0, 0)),
        compiler_params=pltpu.CompilerParams(
            dimension_semantics=("arbitrary",)),
    )(xs_col,
      w1t,
      b1.reshape(1, Cmid).astype(jnp.float32),
      x_mat,
      w2.astype(jnp.float32),
      gamma.reshape(Cout, 1).astype(jnp.float32),
      beta.reshape(Cout, 1).astype(jnp.float32))

    return out.reshape(N, Cout, H, W)                        # free reshape back to NCHW


def _reference(x35, x32, w1, b1, w2, gamma, beta):
    """Pure-JAX reference (NCHW semantics, PyTorch conv-weight layout)."""
    N, Cmid, H, W = x32.shape
    z = x35.reshape(N, -1) @ w1.T + b1                       # [N, 72]
    s = jnp.clip(z / 6.0 + 0.5, 0.0, 1.0)
    x38 = x32 * s.reshape(N, -1, 1, 1)
    y = jnp.einsum('oc,nchw->nohw', w2, x38)                 # [N, 40, H, W]
    mean = jnp.mean(y, axis=(0, 2, 3), keepdims=True)
    var = jnp.mean((y - mean) ** 2, axis=(0, 2, 3), keepdims=True)
    y = (y - mean) * lax.rsqrt(var + 1e-3)
    return y * gamma.reshape(1, -1, 1, 1) + beta.reshape(1, -1, 1, 1)


if __name__ == "__main__":
    key = jax.random.PRNGKey(0)
    k1, k2, k3, k4, k5, k6, k7 = jax.random.split(key, 7)

    N, H, W = 1, 28, 28
    Cse, Cmid, Cout = 24, 72, 40

    # inputs (shapes from the module's forward)
    x32 = jax.random.normal(k1, (N, Cmid, H, W), dtype=jnp.float32)
    x35 = jax.random.normal(k2, (N, Cse, 1, 1), dtype=jnp.float32)

    # deterministic parameter init, PyTorch conv-weight layout ([out, in], 1x1 squeezed)
    w1 = 0.2 * jax.random.normal(k3, (Cmid, Cse), dtype=jnp.float32)     # conv2d12
    b1 = 0.1 * jax.random.normal(k4, (Cmid,), dtype=jnp.float32)
    w2 = 0.2 * jax.random.normal(k5, (Cout, Cmid), dtype=jnp.float32)    # conv2d13 (no bias)
    gamma = 1.0 + 0.1 * jax.random.normal(k6, (Cout,), dtype=jnp.float32)
    beta = 0.1 * jax.random.normal(k7, (Cout,), dtype=jnp.float32)

    out = fused_forward(x35, x32, w1, b1, w2, gamma, beta)
    out = jax.block_until_ready(out)

    ref = _reference(x35, x32, w1, b1, w2, gamma, beta)
    assert out.shape == (N, Cout, H, W)
    assert jnp.allclose(out, ref, atol=1e-4, rtol=1e-4), "mismatch vs JAX reference"

    print("KERNEL_OK")
</pallas_src>

<mosaic_0001>
module attributes {stable_mosaic.version = 11 : i64} {
  func.func @_fused_kernel(%arg0: i32, %arg1: memref<24x1xf32, #tpu.memory_space<vmem>>, %arg2: memref<24x72xf32, #tpu.memory_space<vmem>>, %arg3: memref<1x72xf32, #tpu.memory_space<vmem>>, %arg4: memref<72x784xf32, #tpu.memory_space<vmem>>, %arg5: memref<40x72xf32, #tpu.memory_space<vmem>>, %arg6: memref<40x1xf32, #tpu.memory_space<vmem>>, %arg7: memref<40x1xf32, #tpu.memory_space<vmem>>, %arg8: memref<40x784xf32, #tpu.memory_space<vmem>>) attributes {dimension_semantics = [#tpu.dimension_semantics<arbitrary>], iteration_bounds = array<i64: 1>, scalar_prefetch = 0 : i64, scratch_operands = 0 : i64, tpu.core_type = #tpu.core_type<tc>, window_params = [{pipeline_mode = #tpu.pipeline_mode<synchronous>, transform_indices = @transform_0, window_bounds = array<i64: 24, 1>}, {pipeline_mode = #tpu.pipeline_mode<synchronous>, transform_indices = @transform_1, window_bounds = array<i64: 24, 72>}, {pipeline_mode = #tpu.pipeline_mode<synchronous>, transform_indices = @transform_2, window_bounds = array<i64: 1, 72>}, {pipeline_mode = #tpu.pipeline_mode<synchronous>, transform_indices = @transform_3, window_bounds = array<i64: 72, 784>}, {pipeline_mode = #tpu.pipeline_mode<synchronous>, transform_indices = @transform_4, window_bounds = array<i64: 40, 72>}, {pipeline_mode = #tpu.pipeline_mode<synchronous>, transform_indices = @transform_5, window_bounds = array<i64: 40, 1>}, {pipeline_mode = #tpu.pipeline_mode<synchronous>, transform_indices = @transform_6, window_bounds = array<i64: 40, 1>}, {pipeline_mode = #tpu.pipeline_mode<synchronous>, transform_indices = @transform_7, window_bounds = array<i64: 40, 784>}]} {
    %c0 = arith.constant 0 : index
    %c0_0 = arith.constant 0 : index
    %0 = vector.load %arg2[%c0, %c0_0] : memref<24x72xf32, #tpu.memory_space<vmem>>, vector<24x72xf32>
    %c0_1 = arith.constant 0 : index
    %c0_2 = arith.constant 0 : index
    %1 = vector.load %arg1[%c0_1, %c0_2] : memref<24x1xf32, #tpu.memory_space<vmem>>, vector<24x1xf32>
    %2 = vector.broadcast %1 : vector<24x1xf32> to vector<24x72xf32>
    %3 = arith.mulf %0, %2 : vector<24x72xf32>
    %cst = arith.constant dense<0.000000e+00> : vector<72xf32>
    %4 = vector.multi_reduction <add>, %3, %cst [0] : vector<24x72xf32> to vector<72xf32>
    %5 = vector.shape_cast %4 : vector<72xf32> to vector<1x72xf32>
    %c0_3 = arith.constant 0 : index
    %c0_4 = arith.constant 0 : index
    %6 = vector.load %arg3[%c0_3, %c0_4] : memref<1x72xf32, #tpu.memory_space<vmem>>, vector<1x72xf32>
    %7 = arith.addf %5, %6 : vector<1x72xf32>
    %cst_5 = arith.constant 0.166666672 : f32
    %8 = vector.broadcast %cst_5 : f32 to vector<1x72xf32>
    %9 = arith.mulf %7, %8 : vector<1x72xf32>
    %cst_6 = arith.constant 5.000000e-01 : f32
    %10 = vector.broadcast %cst_6 : f32 to vector<1x72xf32>
    %11 = arith.addf %9, %10 : vector<1x72xf32>
    %cst_7 = arith.constant 0.000000e+00 : f32
    %cst_8 = arith.constant 1.000000e+00 : f32
    %12 = vector.broadcast %cst_7 : f32 to vector<1x72xf32>
    %13 = arith.maximumf %12, %11 : vector<1x72xf32>
    %14 = vector.broadcast %cst_8 : f32 to vector<1x72xf32>
    %15 = arith.minimumf %14, %13 : vector<1x72xf32>
    %c0_9 = arith.constant 0 : index
    %c0_10 = arith.constant 0 : index
    %16 = vector.load %arg5[%c0_9, %c0_10] : memref<40x72xf32, #tpu.memory_space<vmem>>, vector<40x72xf32>
    %17 = vector.broadcast %15 : vector<1x72xf32> to vector<40x72xf32>
    %18 = arith.mulf %16, %17 : vector<40x72xf32>
    %c0_11 = arith.constant 0 : index
    %c0_12 = arith.constant 0 : index
    %19 = vector.load %arg4[%c0_11, %c0_12] : memref<72x784xf32, #tpu.memory_space<vmem>>, vector<72x784xf32>
    %cst_13 = arith.constant dense<0.000000e+00> : vector<40x784xf32>
    %20 = tpu.matmul %18, %19, %cst_13 {dimension_numbers = #tpu.dot_dimension_numbers<[1], [0], [0], [1], [0, 0, 1, 1], [], []>} : vector<40x72xf32>, vector<72x784xf32>, vector<40x784xf32> -> vector<40x784xf32>
    %cst_14 = arith.constant dense<0.000000e+00> : vector<40xf32>
    %21 = vector.multi_reduction <add>, %20, %cst_14 [1] : vector<40x784xf32> to vector<40xf32>
    %22 = vector.shape_cast %21 : vector<40xf32> to vector<40x1xf32>
    %cst_15 = arith.constant 0.00127551018 : f32
    %23 = vector.broadcast %cst_15 : f32 to vector<40x1xf32>
    %24 = arith.mulf %22, %23 : vector<40x1xf32>
    %25 = vector.broadcast %24 : vector<40x1xf32> to vector<40x784xf32>
    %26 = arith.subf %20, %25 : vector<40x784xf32>
    %27 = arith.mulf %26, %26 : vector<40x784xf32>
    %cst_16 = arith.constant dense<0.000000e+00> : vector<40xf32>
    %28 = vector.multi_reduction <add>, %27, %cst_16 [1] : vector<40x784xf32> to vector<40xf32>
    %29 = vector.shape_cast %28 : vector<40xf32> to vector<40x1xf32>
    %cst_17 = arith.constant 0.00127551018 : f32
    %30 = vector.broadcast %cst_17 : f32 to vector<40x1xf32>
    %31 = arith.mulf %29, %30 : vector<40x1xf32>
    %cst_18 = arith.constant 1.000000e-03 : f32
    %32 = vector.broadcast %cst_18 : f32 to vector<40x1xf32>
    %33 = arith.addf %31, %32 : vector<40x1xf32>
    %34 = math.rsqrt %33 : vector<40x1xf32>
    %c0_19 = arith.constant 0 : index
    %c0_20 = arith.constant 0 : index
    %35 = vector.load %arg6[%c0_19, %c0_20] : memref<40x1xf32, #tpu.memory_space<vmem>>, vector<40x1xf32>
    %36 = arith.mulf %35, %34 : vector<40x1xf32>
    %37 = vector.broadcast %36 : vector<40x1xf32> to vector<40x784xf32>
    %38 = arith.mulf %26, %37 : vector<40x784xf32>
    %c0_21 = arith.constant 0 : index
    %c0_22 = arith.constant 0 : index
    %39 = vector.load %arg7[%c0_21, %c0_22] : memref<40x1xf32, #tpu.memory_space<vmem>>, vector<40x1xf32>
    %40 = vector.broadcast %39 : vector<40x1xf32> to vector<40x784xf32>
    %41 = arith.addf %38, %40 : vector<40x784xf32>
    %c0_23 = arith.constant 0 : index
    %c0_24 = arith.constant 0 : index
    %42 = vector.load %arg8[%c0_23, %c0_24] : memref<40x784xf32, #tpu.memory_space<vmem>>, vector<40x784xf32>
    tpu.vector_store %arg8[%c0_23, %c0_24], %41 {strides = array<i32>} : memref<40x784xf32, #tpu.memory_space<vmem>>, vector<40x784xf32>,
    return
  }
  func.func @transform_0(%arg0: i32) -> (i32, i32) {
    %c0_i32 = arith.constant 0 : i32
    %c0_i32_0 = arith.constant 0 : i32
    %c0_i32_1 = arith.constant 0 : i32
    return %c0_i32, %c0_i32_0 : i32, i32
  }
  func.func @transform_1(%arg0: i32) -> (i32, i32) {
    %c0_i32 = arith.constant 0 : i32
    %c0_i32_0 = arith.constant 0 : i32
    %c0_i32_1 = arith.constant 0 : i32
    return %c0_i32, %c0_i32_0 : i32, i32
  }
  func.func @transform_2(%arg0: i32) -> (i32, i32) {
    %c0_i32 = arith.constant 0 : i32
    %c0_i32_0 = arith.constant 0 : i32
    %c0_i32_1 = arith.constant 0 : i32
    return %c0_i32, %c0_i32_0 : i32, i32
  }
  func.func @transform_3(%arg0: i32) -> (i32, i32) {
    %c0_i32 = arith.constant 0 : i32
    %c0_i32_0 = arith.constant 0 : i32
    %c0_i32_1 = arith.constant 0 : i32
    return %c0_i32, %c0_i32_0 : i32, i32
  }
  func.func @transform_4(%arg0: i32) -> (i32, i32) {
    %c0_i32 = arith.constant 0 : i32
    %c0_i32_0 = arith.constant 0 : i32
    %c0_i32_1 = arith.constant 0 : i32
    return %c0_i32, %c0_i32_0 : i32, i32
  }
  func.func @transform_5(%arg0: i32) -> (i32, i32) {
    %c0_i32 = arith.constant 0 : i32
    %c0_i32_0 = arith.constant 0 : i32
    %c0_i32_1 = arith.constant 0 : i32
    return %c0_i32, %c0_i32_0 : i32, i32
  }
  func.func @transform_6(%arg0: i32) -> (i32, i32) {
    %c0_i32 = arith.constant 0 : i32
    %c0_i32_0 = arith.constant 0 : i32
    %c0_i32_1 = arith.constant 0 : i32
    return %c0_i32, %c0_i32_0 : i32, i32
  }
  func.func @transform_7(%arg0: i32) -> (i32, i32) {
    %c0_i32 = arith.constant 0 : i32
    %c0_i32_0 = arith.constant 0 : i32
    %c0_i32_1 = arith.constant 0 : i32
    return %c0_i32, %c0_i32_0 : i32, i32
  }
}

</mosaic_0001>

<bundles_post_ra>
// kernel: tpu_custom_call.1
= control target key start
LH: loop header
LB: loop body
LE: loop exit
PB: predicated region body
PF: predicated region fallthrough
CT: control target
= control target key end

     0   :  { %12 = vsyncpa [#allocation3], 0  ;;  %s1647_s0 = inlined_call_operand.vmem [shape: f32[24,1], index: 0, kind: input, shape index: {}]   ;;  %s1648_s1 = inlined_call_operand.vmem [shape: f32[24,72], index: 1, kind: input, shape index: {}]   ;;  %s1649_s2 = inlined_call_operand.vmem [shape: f32[1,72], index: 2, kind: input, shape index: {}]   ;;  %s1650_s3 = inlined_call_operand.hbm [shape: f32[72,784], index: 3, kind: input, shape index: {}]   ;;  %s1651_s4 = inlined_call_operand.vmem [shape: f32[40,72], index: 4, kind: input, shape index: {}]   ;;  %s1652_s5 = inlined_call_operand.vmem [shape: f32[40,1], index: 5, kind: input, shape index: {}]   ;;  %s1653_s6 = inlined_call_operand.vmem [shape: f32[40,1], index: 6, kind: input, shape index: {}]   ;;  %s1654_s7 = inlined_call_operand.hbm [shape: f32[40,784], index: 7, kind: output, shape index: {}]  }
   0x1   :  { %13 = vsyncpa [#allocation4], 0  ;;  %s1113_s24 = smov [#allocation2]   ;;  %s1065_s28 = scalar_lea.hbm %s1650_s3, 8064 }
   0x2   :  { %s25_s25 = sshll.u32 %s1113_s24, 4  ;;  %p1066_p0 = scmp.ne.s32.totalorder %s1650_s3, %s1065_s28  ;;  %s26_s25 = int_to_ptr.vmem [resolvable:$true] %s25_s25 }
   0x3   :  { %p1069_p1 = scmp.lt.u32.totalorder %s1065_s28, %s1650_s3 }
   0x5   :  { %p1071_p2 = pnand %p1069_p1, %p1066_p0 }
   0x7   :  { %1074 = shalt.err (!%p1071_p2)
}
   0x8   :  { %s1075_s10 = scalar_lea.vmem %s26_s25, 8064  ;;  %p1080_p4 = scmp.lt.s32.totalorder %s26_s25, %s26_s25 }
   0x9   :  { %p1076_p3 = scmp.ne.s32.totalorder %s26_s25, %s1075_s10  ;;  %p1081_p5 = scmp.lt.s32.totalorder %s1075_s10, %s1075_s10 }
   0xb   :  { %p1082_p6 = por %p1081_p5, %p1080_p4 }
   0xd   :  { %p1083_p7 = pnand %p1082_p6, %p1076_p3 }
   0xf   :  { %1086 = shalt.err (!%p1083_p7)
}
  0x10   :  { %s1114_s11 = smov 896   ;;  %s1115_s12 = smov 56  }
  0x11   :  { %31 = dma.hbm_to_vmem [thread:$0]  %s1650_s3, 8064, %s26_s25, [#allocation3], %s1114_s11, %s1114_s11, %s1115_s12  }
  0x12   :  { %1109 = dma.done.wait [#allocation3], 8064  }
  0x13   :  { %1110 = vsyncadd [#allocation3], 4294959232  ;;  %v1116_v0 = vmov 0   ;;  %v44_v1 = vld [vmem:[%s1647_s0] sm:$0xff]  ;;  %v46_v2 = vld [vmem:[%s1647_s0 + $0x10] sm:$0xff]  ;;  %v1117_v58 = vmov 0.0  }
  0x14   :  { %1053 = vset.pattern.permute.xlu0 %v1116_v0  ;;  %1054 = vset.pattern.permute.xlu1 %v1116_v0  ;;  %v45_v3 = vld [vmem:[%s1647_s0 + $0x8] sm:$0xff]  ;;  %v98_v4 = vld [vmem:[#allocation2 + $0x8] sm:$0xff]  ;;  %v105_v5 = vld [vmem:[#allocation2 + $0x40] sm:$0xff]  ;;  %v1118_v60 = vmov 0.0|0.0   ;;  %vm65_vm0 = vcmask 588800   ;;  %vm1119_vm1 = vmmov 0  }
  0x15   :  { %49 = vperm.xlu0 %1053, %v44_v1   ;;  %59 = vperm.xlu1 %1054, %v46_v2   ;;  %v100_v6 = vld [vmem:[#allocation2 + $0x18] sm:$0xff]  ;;  %v985_v7 = vpack.c.bf16 %v105_v5, %v98_v4  ;;  %v97_v8 = vld [vmem:[#allocation2] sm:$0xff]  ;;  %v107_v10 = vld [vmem:[#allocation2 + $0x50] sm:$0xff]  ;;  %vm555_vm2 = vcmask 130048  }
  0x16   :  { %v104_v9 = vld [vmem:[#allocation2 + $0x38] sm:$0xff]  ;;  %v1001_v12 = vpack.c.bf16 %v107_v10, %v100_v6  ;;  %v99_v13 = vld [vmem:[#allocation2 + $0x10] sm:$0xff]  ;;  %v106_v14 = vld [vmem:[#allocation2 + $0x48] sm:$0xff]  ;;  %239 = vmatprep.mubr.f32.mxu0 %v1117_v58  ;;  %334 = vmatprep.mubr.f32.mxu1 %v1117_v58 }
  0x17   :  { %v987_v11 = vpack.c.bf16 %v104_v9, %v97_v8  ;;  %986 = vmatprep.subr.bf16.mxu0 %v985_v7  ;;  %v1003_v15 = vpack.c.bf16 %v106_v14, %v99_v13  ;;  %v112_v16 = vld [vmem:[#allocation2 + $0x78] sm:$0xff]  ;;  %v119_v17 = vld [vmem:[#allocation2 + $0xb0] sm:$0xff]  ;;  %v114_v18 = vld [vmem:[#allocation2 + $0x88] sm:$0xff] }
  0x18   :  { %1002 = vmatprep.subr.bf16.mxu1 %v1001_v12  ;;  %v989_v19 = vpack.c.bf16 %v119_v17, %v112_v16  ;;  %v111_v20 = vld [vmem:[#allocation2 + $0x70] sm:$0xff]  ;;  %v118_v21 = vld [vmem:[#allocation2 + $0xa8] sm:$0xff]  ;;  %v121_v22 = vld [vmem:[#allocation2 + $0xc0] sm:$0xff]  ;;  %v88_v17 = vlaneseq }
  0x19   :  { %54 = vperm.xlu0 %1053, %v45_v3   ;;  %988 = vmatpush1.bf16.msra.mxu0 %v987_v11  ;;  %v991_v23 = vpack.c.bf16 %v118_v21, %v111_v20  ;;  %v1005_v24 = vpack.c.bf16 %v121_v22, %v114_v18  ;;  %v113_v25 = vld [vmem:[#allocation2 + $0x80] sm:$0xff]  ;;  %v120_v26 = vld [vmem:[#allocation2 + $0xb8] sm:$0xff]  ;;  %v126_v28 = vld [vmem:[#allocation2 + $0xe8] sm:$0xff] }
  0x1a   :  { %1004 = vmatpush1.bf16.msra.mxu1 %v1003_v15  ;;  %990 = vmatprep.subr.bf16.mxu0 %v989_v19  ;;  %v1007_v27 = vpack.c.bf16 %v120_v26, %v113_v25  ;;  %v133_v29 = vld [vmem:[#allocation2 + $0x120] sm:$0xff]  ;;  %v128_v30 = vld [vmem:[#allocation2 + $0xf8] sm:$0xff]  ;;  %v135_v34 = vld [vmem:[#allocation2 + $0x130] sm:$0xff]  ;;  %v89_v20 = vshrl.u32 %v88_v17, 7 }
  0x1b   :  { %1006 = vmatprep.subr.bf16.mxu1 %v1005_v24  ;;  %v993_v31 = vpack.c.bf16 %v133_v29, %v126_v28  ;;  %v125_v32 = vld [vmem:[#allocation2 + $0xe0] sm:$0xff]  ;;  %v132_v33 = vld [vmem:[#allocation2 + $0x118] sm:$0xff]  ;;  %v1009_v36 = vpack.c.bf16 %v135_v34, %v128_v30  ;;  %v127_v37 = vld [vmem:[#allocation2 + $0xf0] sm:$0xff] }
  0x1c   :  { %v995_v35 = vpack.c.bf16 %v132_v33, %v125_v32  ;;  %v134_v38 = vld [vmem:[#allocation2 + $0x128] sm:$0xff]  ;;  %v140_v40 = vld [vmem:[#allocation2 + $0x158] sm:$0xff]  ;;  %v147_v41 = vld [vmem:[#allocation2 + $0x190] sm:$0xff] }
  0x1d   :  { %992 = vmatpush1.bf16.msra.mxu0 %v991_v23  ;;  %v1011_v39 = vpack.c.bf16 %v134_v38, %v127_v37  ;;  %v142_v42 = vld [vmem:[#allocation2 + $0x168] sm:$0xff]  ;;  %v997_v43 = vpack.c.bf16 %v147_v41, %v140_v40  ;;  %v139_v44 = vld [vmem:[#allocation2 + $0x150] sm:$0xff]  ;;  %v149_v46 = vld [vmem:[#allocation2 + $0x1a0] sm:$0xff]  ;;  %v90_v23 = vsub.s32 0, %v89_v20 }
  0x1e   :  { %1008 = vmatpush1.bf16.msra.mxu1 %v1007_v27  ;;  %994 = vmatprep.subr.bf16.mxu0 %v993_v31  ;;  %v146_v45 = vld [vmem:[#allocation2 + $0x188] sm:$0xff]  ;;  %v1013_v48 = vpack.c.bf16 %v149_v46, %v142_v42  ;;  %v141_v49 = vld [vmem:[#allocation2 + $0x160] sm:$0xff]  ;;  %v148_v50 = vld [vmem:[#allocation2 + $0x198] sm:$0xff] }
  0x1f   :  { %1010 = vmatprep.subr.bf16.mxu1 %v1009_v36  ;;  %v999_v47 = vpack.c.bf16 %v146_v45, %v139_v44  ;;  %v1015_v51 = vpack.c.bf16 %v148_v50, %v141_v49  ;;  %v154_v52 = vld [vmem:[#allocation2 + $0x1c8] sm:$0xff]  ;;  %v153_v53 = vld [vmem:[#allocation2 + $0x1c0] sm:$0xff]  ;;  %v156_v54 = vld [vmem:[#allocation2 + $0x1d8] sm:$0xff] }
  0x20   :  { %v155_v55 = vld [vmem:[#allocation2 + $0x1d0] sm:$0xff]  ;;  %v102_v56 = vld [vmem:[#allocation2 + $0x28] sm:$0xff]  ;;  %v109_v57 = vld [vmem:[#allocation2 + $0x60] sm:$0xff] }
  0x21   :  { %996 = vmatpush1.bf16.msra.mxu0 %v995_v35  ;;  %v1017_v59 = vpack.c.bf16 %v109_v57, %v102_v56  ;;  %v41_v62 = vld [vmem:[%s1648_s1] sm:$0xff]  ;;  %v43_v0 = vld [vmem:[%s1648_s1 + $0x10] sm:$0xff]  ;;  %v42_v1 = vld [vmem:[%s1648_s1 + $0x8] sm:$0xff] }
  0x22   :  { %1012 = vmatpush1.bf16.msra.mxu1 %v1011_v39  ;;  %998 = vmatprep.subr.bf16.mxu0 %v997_v43  ;;  %v77_v16 = vld [vmem:[%s1649_s2] sm:$0x1]  ;;  %v101_v26 = vld [vmem:[#allocation2 + $0x20] sm:$0xff]  ;;  %v108_v27 = vld [vmem:[#allocation2 + $0x58] sm:$0xff] }
  0x23   :  { %1014 = vmatprep.subr.bf16.mxu1 %v1013_v48  ;;  %v83_v28 = vld [vmem:[%s1651_s4] sm:$0xff]  ;;  %v116_v29 = vld [vmem:[#allocation2 + $0x98] sm:$0xff]  ;;  %v123_v30 = vld [vmem:[#allocation2 + $0xd0] sm:$0xff]  ;;  %v1019_v34 = vpack.c.bf16 %v108_v27, %v101_v26 }
  0x24   :  { %v103_v32 = vld [vmem:[#allocation2 + $0x30] sm:$0xff]  ;;  %v110_v33 = vld [vmem:[#allocation2 + $0x68] sm:$0xff]  ;;  %v1021_v36 = vpack.c.bf16 %v123_v30, %v116_v29  ;;  %v117_v41 = vld [vmem:[#allocation2 + $0xa0] sm:$0xff] }
  0x25   :  { %1000 = vmatpush1.bf16.msra.mxu0 %v999_v47  ;;  %v115_v37 = vld [vmem:[#allocation2 + $0x90] sm:$0xff]  ;;  %v122_v38 = vld [vmem:[#allocation2 + $0xc8] sm:$0xff]  ;;  %v1034_v39 = vpack.c.bf16 %v110_v33, %v103_v32  ;;  %v137_v43 = vld [vmem:[#allocation2 + $0x140] sm:$0xff] }
  0x26   :  { %1016 = vmatpush1.bf16.msra.mxu1 %v1015_v51  ;;  %191 = vmatprep.subr.mxu0 %v154_v52  ;;  %v84_v40 = vld [vmem:[%s1651_s4 + $0x8] sm:$0xff]  ;;  %v130_v42 = vld [vmem:[#allocation2 + $0x108] sm:$0xff]  ;;  %v124_v44 = vld [vmem:[#allocation2 + $0xd8] sm:$0xff]  ;;  %v1023_v45 = vpack.c.bf16 %v122_v38, %v115_v37 }
  0x27   :  { %286 = vmatprep.subr.mxu1 %v156_v54  ;;  %v129_v47 = vld [vmem:[#allocation2 + $0x100] sm:$0xff]  ;;  %v136_v48 = vld [vmem:[#allocation2 + $0x138] sm:$0xff]  ;;  %v1025_v49 = vpack.c.bf16 %v137_v43, %v130_v42  ;;  %v1037_v50 = vpack.c.bf16 %v124_v44, %v117_v41  ;;  %v131_v52 = vld [vmem:[#allocation2 + $0x110] sm:$0xff] }
  0x28   :  { %v85_v51 = vld [vmem:[%s1651_s4 + $0x10] sm:$0xff]  ;;  %v151_v54 = vld [vmem:[#allocation2 + $0x1b0] sm:$0xff]  ;;  %v1027_v56 = vpack.c.bf16 %v136_v48, %v129_v47 }
  0x29   :  { %192 = vmatpush1.msra.mxu0 %v153_v53  ;;  %v144_v53 = vld [vmem:[#allocation2 + $0x178] sm:$0xff] }
  0x2a   :  { %287 = vmatpush1.msra.mxu1 %v155_v55  ;;  %1018 = vmatprep.subr.bf16.mxu0 %v1017_v59  ;;  %v138_v55 = vld [vmem:[#allocation2 + $0x148] sm:$0xff]  ;;  %v143_v59 = vld [vmem:[#allocation2 + $0x170] sm:$0xff] }
  0x2b   :  { %1033 = vmatprep.subr.bf16.mxu1 %v1118_v60 }
  0x94   :  { %v50_v61 = vpop.permute.xlu0 %49  ;;  %v60_v63 = vpop.permute.xlu1 %59 }
  0x95   :  { %v62_v2 = vmul.f32 %v50_v61, %v41_v62  ;;  %v64_v3 = vmul.f32 %v60_v63, %v43_v0  ;;  %v150_v61 = vld [vmem:[#allocation2 + $0x1a8] sm:$0xff]  ;;  %v1029_v62 = vpack.c.bf16 %v151_v54, %v144_v53  ;;  %v1040_v63 = vpack.c.bf16 %v138_v55, %v131_v52  ;;  %v86_v0 = vld [vmem:[%s1651_s4 + $0x18] sm:$0xff] }
  0x97   :  { %v66_v6 = vsel %vm65_vm0, %v62_v2, 0.0  ;;  %v69_v8 = vsel %vm65_vm0, %v64_v3, 0.0  ;;  %v152_v2 = vld [vmem:[#allocation2 + $0x1b8] sm:$0xff]  ;;  %v1031_v3 = vpack.c.bf16 %v150_v61, %v143_v59 }
  0x98   :  { %v55_v4 = vpop.permute.xlu0 %54 }
  0x99   :  { %v63_v5 = vmul.f32 %v55_v4, %v42_v1  ;;  %v145_v1 = vld [vmem:[#allocation2 + $0x180] sm:$0xff] }
  0x9b   :  { %v67_v7 = vsel %vm65_vm0, %v63_v5, 0.0  ;;  %v1043_v5 = vpack.c.bf16 %v152_v2, %v145_v1 }
  0x9c   :  { %v68_v9 = vadd.f32 %v67_v7, %v66_v6  ;;  %v87_v6 = vld [vmem:[%s1651_s4 + $0x20] sm:$0xff] }
  0x9d   :  { %v158_v7 = vld [vmem:[#allocation2 + $0x1e8] sm:$0xff] }
  0x9e   :  { %v70_v10 = vadd.f32 %v69_v8, %v68_v9  ;;  %v157_v9 = vld [vmem:[#allocation2 + $0x1e0] sm:$0xff] }
  0xa0   :  { %v71_v11 = vrot.slane %v70_v10, 4 }
  0xa2   :  { %v72_v12 = vadd.f32 %v71_v11, %v70_v10  ;;  %v159_v10 = vld [vmem:[#allocation2 + $0x1f0] sm:$0xff] }
  0xa4   :  { %v73_v13 = vrot.slane %v72_v12, 2 }
  0xa6   :  { %v74_v14 = vadd.f32 %v73_v13, %v72_v12 }
  0xa8   :  { %v75_v15 = vrot.slane %v74_v14, 1 }
  0xaa   :  { %v76_v18 = vadd.f32 %v75_v15, %v74_v14 }
  0xac   :  { %v78_v19 = vadd.f32 %v77_v16, %v76_v18 }
  0xae   :  { %v79_v21 = vmul.f32 0.16666667, %v78_v19 }
  0xb0   :  { %v80_v22 = vadd.f32 0.5, %v79_v21 }
  0xb2   :  { %v81_v24 = vmax.f32 %v80_v22, 0.0 }
  0xb4   :  { %v82_v25 = vmin.f32 %v81_v24, 1.0 }
  0xb6   :  { %v1206_v31 = vrot.slane %v82_v25, %v90_v23 }
  0xb8   :  { %v1209_v35 = vmul.f32 %v1206_v31, %v83_v28  ;;  %v1221_v46 = vmul.f32 %v1206_v31, %v84_v40  ;;  %v94_v57 = vmul.f32 %v1206_v31, %v85_v51  ;;  %v95_v4 = vmul.f32 %v1206_v31, %v86_v0 }
  0xb9   :  { %v96_v8 = vmul.f32 %v1206_v31, %v87_v6 }
  0xba   :  { %918 = vmatmul.mubr.msk.f32.vlgmr.msra.gmra.mrb[0].mxu0 %vm65_vm0, %v1209_v35  ;;  %923 = vmatmul.mubr.msk.f32.vlgmr.msra.gmra.mrb[0].mxu1 %vm65_vm0, %v1209_v35 }
  0xbb   :  { %1020 = vmatpush1.bf16.msra.mxu0 %v1019_v34  ;;  %245 = vmatprep.mubr.f32.mxu0 %v1117_v58 }
  0xbc   :  { %340 = vmatprep.mubr.f32.mxu1 %v1117_v58  ;;  %1022 = vmatprep.subr.bf16.mxu0 %v1021_v36 }
  0xbd   :  { %1035 = vmatpush3.bf16.msra.mxu1 %v1034_v39 }
  0xbe   :  { %919 = vmatmul.mubr.msk.f32.gmra.mrb[2].mxu0 %vm65_vm0, %v1221_v46  ;;  %924 = vmatmul.mubr.msk.f32.gmra.mrb[2].mxu1 %vm65_vm0, %v1221_v46 }
  0xbf   :  { %1024 = vmatpush1.bf16.msra.mxu0 %v1023_v45  ;;  %1036 = vmatprep.subr.bf16.mxu1 %v1118_v60 }
  0xc0   :  { %251 = vmatprep.mubr.f32.mxu0 %v1117_v58  ;;  %346 = vmatprep.mubr.f32.mxu1 %v1117_v58 }
  0xc1   :  { %1026 = vmatprep.subr.bf16.mxu0 %v1025_v49  ;;  %1038 = vmatpush3.bf16.msra.mxu1 %v1037_v50 }
  0xc2   :  { %920 = vmatmul.mubr.msk.f32.gmra.mrb[4].mxu0 %vm65_vm0, %v94_v57  ;;  %925 = vmatmul.mubr.msk.f32.gmra.mrb[4].mxu1 %vm65_vm0, %v94_v57 }
  0xc3   :  { %1028 = vmatpush1.bf16.msra.mxu0 %v1027_v56  ;;  %1039 = vmatprep.subr.bf16.mxu1 %v1118_v60 }
  0xc4   :  { %257 = vmatprep.mubr.f32.mxu0 %v1117_v58  ;;  %352 = vmatprep.mubr.f32.mxu1 %v1117_v58 }
  0xc5   :  { %1030 = vmatprep.subr.bf16.mxu0 %v1029_v62  ;;  %1041 = vmatpush3.bf16.msra.mxu1 %v1040_v63 }
  0xc6   :  { %921 = vmatmul.mubr.msk.f32.gmra.mrb[6].mxu0 %vm65_vm0, %v95_v4  ;;  %926 = vmatmul.mubr.msk.f32.gmra.mrb[6].mxu1 %vm65_vm0, %v95_v4 }
  0xc7   :  { %1032 = vmatpush1.bf16.msra.mxu0 %v1031_v3  ;;  %1042 = vmatprep.subr.bf16.mxu1 %v1118_v60 }
  0xc8   :  { %263 = vmatprep.mubr.f32.mxu0 %v1117_v58  ;;  %358 = vmatprep.mubr.f32.mxu1 %v1117_v58 }
  0xc9   :  { %381 = vmatprep.subr.mxu0 %v158_v7  ;;  %1044 = vmatpush3.bf16.msra.mxu1 %v1043_v5 }
  0xca   :  { %922 = vmatmul.mubr.msk.f32.gmra.mrb[8].mxu0 %vm65_vm0, %v96_v8  ;;  %927 = vmatmul.mubr.msk.f32.gmra.mrb[8].mxu1 %vm65_vm0, %v96_v8 }
  0xcb   :  { %382 = vmatpush1.msra.mxu0 %v157_v9  ;;  %968 = vmatprep.subr.mxu1 %v1117_v58 }
  0xcc   :  { %429 = vmatprep.mubr.f32.mxu0 %v1117_v58  ;;  %970 = vmatprep.mubr.msk.f32.mxu1 %vm1119_vm1, %v1117_v58 }
  0xcd   :  { %969 = vmatpush3.msra.mxu1 %v159_v10 }
  0xce   :  { %928 = vmatmul.mubr.msk.f32.vlgmr.msra.gmra.mrb[10].mxu0 %vm65_vm0, %v1209_v35  ;;  %971 = vmatmul.mubr.msk.f32.vlgmr.msra.gmra.mrb[10].mxu1 %vm65_vm0, %v1209_v35 }
  0xcf   :  { %435 = vmatprep.mubr.f32.mxu0 %v1117_v58  ;;  %973 = vmatprep.mubr.msk.f32.mxu1 %vm1119_vm1, %v1117_v58 }
  0xd2   :  { %929 = vmatmul.mubr.msk.f32.gmra.mrb[12].mxu0 %vm65_vm0, %v1221_v46  ;;  %974 = vmatmul.mubr.msk.f32.gmra.mrb[12].mxu1 %vm65_vm0, %v1221_v46 }
  0xd3   :  { %441 = vmatprep.mubr.f32.mxu0 %v1117_v58  ;;  %976 = vmatprep.mubr.msk.f32.mxu1 %vm1119_vm1, %v1117_v58 }
  0xd6   :  { %930 = vmatmul.mubr.msk.f32.gmra.mrb[14].mxu0 %vm65_vm0, %v94_v57  ;;  %977 = vmatmul.mubr.msk.f32.gmra.mrb[14].mxu1 %vm65_vm0, %v94_v57 }
  0xd7   :  { %447 = vmatprep.mubr.f32.mxu0 %v1117_v58  ;;  %979 = vmatprep.mubr.msk.f32.mxu1 %vm1119_vm1, %v1117_v58 }
  0xda   :  { %931 = vmatmul.mubr.msk.f32.gmra.mrb[16].mxu0 %vm65_vm0, %v95_v4  ;;  %980 = vmatmul.mubr.msk.f32.gmra.mrb[16].mxu1 %vm65_vm0, %v95_v4 }
  0xdb   :  { %453 = vmatprep.mubr.f32.mxu0 %v1117_v58  ;;  %982 = vmatprep.mubr.msk.f32.mxu1 %vm1119_vm1, %v1117_v58 }
  0xde   :  { %932 = vmatmul.mubr.msk.f32.gmra.mrb[18].mxu0 %vm65_vm0, %v96_v8  ;;  %983 = vmatmul.mubr.msk.f32.gmra.mrb[18].mxu1 %vm65_vm0, %v96_v8 }
 0x18d   :  { %v1284_v60 = vpop.f32.mrb[0].mxu0  ;;  %v1286_v11 = vpop.f32.mrb[0].mxu1 }
 0x18e   :  { %v1288_v12 = vpop.f32.mrb[1].mxu0  ;;  %v1290_v13 = vpop.f32.mrb[1].mxu1 }
 0x18f   :  { %v550_v14 = vadd.f32 %v1288_v12, %v1284_v60 }
 0x191   :  { %v551_v15 = vadd.f32 %v550_v14, %v1286_v11  ;;  %v1295_v16 = vpop.f32.mrb[2].mxu0  ;;  %v1297_v58 = vpop.f32.mrb[2].mxu1 }
 0x192   :  { %v1299_v17 = vpop.f32.mrb[3].mxu0  ;;  %v1301_v18 = vpop.f32.mrb[3].mxu1 }
 0x193   :  { %v552_v19 = vadd.f32 %v551_v15, %v1290_v13  ;;  %v560_v20 = vadd.f32 %v1299_v17, %v1295_v16 }
 0x195   :  { %v561_v21 = vadd.f32 %v560_v20, %v1297_v58  ;;  %v1307_v22 = vpop.f32.mrb[4].mxu0  ;;  %v1309_v23 = vpop.f32.mrb[4].mxu1 }
 0x196   :  { %v1311_v24 = vpop.f32.mrb[5].mxu0  ;;  %v1313_v25 = vpop.f32.mrb[5].mxu1 }
 0x197   :  { %v562_v26 = vadd.f32 %v561_v21, %v1301_v18  ;;  %v569_v27 = vadd.f32 %v1311_v24, %v1307_v22 }
 0x199   :  { %v570_v28 = vadd.f32 %v569_v27, %v1309_v23  ;;  %v1319_v29 = vpop.f32.mrb[6].mxu0  ;;  %v1321_v30 = vpop.f32.mrb[6].mxu1 }
 0x19a   :  { %v1323_v31 = vpop.f32.mrb[7].mxu0  ;;  %v1325_v32 = vpop.f32.mrb[7].mxu1 }
 0x19b   :  { %v571_v33 = vadd.f32 %v570_v28, %v1313_v25  ;;  %v578_v34 = vadd.f32 %v1323_v31, %v1319_v29 }
 0x19d   :  { %v579_v35 = vadd.f32 %v578_v34, %v1321_v30  ;;  %v1331_v36 = vpop.f32.mrb[8].mxu0  ;;  %v1333_v37 = vpop.f32.mrb[8].mxu1 }
 0x19e   :  { %v1335_v38 = vpop.f32.mrb[9].mxu0  ;;  %v1337_v39 = vpop.f32.mrb[9].mxu1 }
 0x19f   :  { %v580_v40 = vadd.f32 %v579_v35, %v1325_v32  ;;  %v587_v41 = vadd.f32 %v1335_v38, %v1331_v36 }
 0x1a1   :  { %v588_v42 = vadd.f32 %v587_v41, %v1333_v37  ;;  %v431_v43 = vpop.f32.mrb[10].mxu0  ;;  %v526_v44 = vpop.f32.mrb[10].mxu1 }
 0x1a2   :  { %v553_v45 = vadd.f32 %v552_v19, %v431_v43  ;;  %v433_v46 = vpop.f32.mrb[11].mxu0  ;;  %v972_v47 = vpop.f32.mrb[11].mxu1  ;;  %v556_v50 = vsel %vm555_vm2, %v526_v44, 0.0 }
 0x1a3   :  { %v589_v48 = vadd.f32 %v588_v42, %v1337_v39 }
 0x1a4   :  { %v554_v49 = vadd.f32 %v553_v45, %v433_v46 }
 0x1a5   :  { %v1345_v51 = vpop.f32.mrb[12].mxu0  ;;  %v1347_v52 = vpop.f32.mrb[12].mxu1 }
 0x1a6   :  { %v563_v53 = vadd.f32 %v562_v26, %v1345_v51  ;;  %v1350_v54 = vpop.f32.mrb[13].mxu0  ;;  %v975_v55 = vpop.f32.mrb[13].mxu1  ;;  %v557_v56 = vadd.f32 %v556_v50, %v554_v49  ;;  %v565_v59 = vsel %vm555_vm2, %v1347_v52, 0.0 }
 0x1a8   :  { %v564_v57 = vadd.f32 %v563_v53, %v1350_v54  ;;  %558 = vadd.xlane.f32.xlu1 %v557_v56 }
 0x1a9   :  { %v1355_v61 = vpop.f32.mrb[14].mxu0  ;;  %v1357_v62 = vpop.f32.mrb[14].mxu1 }
 0x1aa   :  { %v572_v63 = vadd.f32 %v571_v33, %v1355_v61  ;;  %v1360_v0 = vpop.f32.mrb[15].mxu0  ;;  %v978_v1 = vpop.f32.mrb[15].mxu1  ;;  %v566_v2 = vadd.f32 %v565_v59, %v564_v57  ;;  %v574_v4 = vsel %vm555_vm2, %v1357_v62, 0.0 }
 0x1ac   :  { %v573_v3 = vadd.f32 %v572_v63, %v1360_v0  ;;  %567 = vadd.xlane.f32.xlu0 %v566_v2 }
 0x1ad   :  { %v1365_v5 = vpop.f32.mrb[16].mxu0  ;;  %v1367_v6 = vpop.f32.mrb[16].mxu1 }
 0x1ae   :  { %v581_v7 = vadd.f32 %v580_v40, %v1365_v5  ;;  %v1370_v8 = vpop.f32.mrb[17].mxu0  ;;  %v981_v9 = vpop.f32.mrb[17].mxu1  ;;  %v575_v10 = vadd.f32 %v574_v4, %v573_v3  ;;  %v583_v15 = vsel %vm555_vm2, %v1367_v6, 0.0 }
 0x1b0   :  { %v582_v14 = vadd.f32 %v581_v7, %v1370_v8  ;;  %576 = vadd.xlane.f32.xlu0 %v575_v10 }
 0x1b1   :  { %v1375_v19 = vpop.f32.mrb[18].mxu0  ;;  %v1377_v20 = vpop.f32.mrb[18].mxu1 }
 0x1b2   :  { %v590_v21 = vadd.f32 %v589_v48, %v1375_v19  ;;  %v1380_v26 = vpop.f32.mrb[19].mxu0  ;;  %v984_v27 = vpop.f32.mrb[19].mxu1  ;;  %v584_v28 = vadd.f32 %v583_v15, %v582_v14  ;;  %v592_v34 = vsel %vm555_vm2, %v1377_v20, 0.0 }
 0x1b4   :  { %v591_v33 = vadd.f32 %v590_v21, %v1380_v26  ;;  %585 = vadd.xlane.f32.xlu1 %v584_v28 }
 0x1b6   :  { %v593_v35 = vadd.f32 %v592_v34, %v591_v33 }
 0x1b8   :  { %594 = vadd.xlane.f32.xlu0 %v593_v35 }
 0x235   :  { %v559_v40 = vpop.xlane.xlu1 %558 }
 0x236   :  { %v596_v41 = vmul.f32 0.0012755102, %v559_v40 }
 0x238   :  { %v1386_v42 = vsub.f32 %v1284_v60, %v596_v41  ;;  %v1389_v45 = vsub.f32 %v1288_v12, %v596_v41  ;;  %v1392_v47 = vsub.f32 %v1286_v11, %v596_v41  ;;  %v1395_v49 = vsub.f32 %v1290_v13, %v596_v41 }
 0x239   :  { %v568_v48 = vpop.xlane.xlu0 %567  ;;  %v1397_v50 = vsub.f32 %v526_v44, %v596_v41  ;;  %v1403_v56 = vsub.f32 %v431_v43, %v596_v41  ;;  %v1405_v12 = vsub.f32 %v433_v46, %v596_v41 }
 0x23a   :  { %v597_v53 = vmul.f32 0.0012755102, %v568_v48  ;;  %v636_v55 = vmul.f32 %v1386_v42, %v1386_v42  ;;  %v637_v60 = vmul.f32 %v1389_v45, %v1389_v45  ;;  %v638_v11 = vmul.f32 %v1392_v47, %v1392_v47 }
 0x23b   :  { %v642_v13 = vmul.f32 %v1397_v50, %v1397_v50  ;;  %v639_v43 = vmul.f32 %v1395_v49, %v1395_v49  ;;  %v641_v9 = vmul.f32 %v1405_v12, %v1405_v12 }
 0x23c   :  { %v671_v57 = vadd.f32 %v637_v60, %v636_v55  ;;  %v1412_v44 = vsub.f32 %v1295_v16, %v597_v53  ;;  %v1415_v59 = vsub.f32 %v1299_v17, %v597_v53  ;;  %v1420_v46 = vsub.f32 %v1297_v58, %v597_v53 }
 0x23d   :  { %v577_v63 = vpop.xlane.xlu0 %576  ;;  %v1423_v3 = vsub.f32 %v1301_v18, %v597_v53  ;;  %v640_v16 = vmul.f32 %v1403_v56, %v1403_v56  ;;  %v1430_v17 = vsub.f32 %v1345_v51, %v597_v53  ;;  %v1433_v7 = vsub.f32 %v1347_v52, %v597_v53 }
 0x23e   :  { %v598_v1 = vmul.f32 0.0012755102, %v577_v63  ;;  %v672_v2 = vadd.f32 %v671_v57, %v638_v11  ;;  %v643_v4 = vmul.f32 %v1412_v44, %v1412_v44  ;;  %v644_v58 = vmul.f32 %v1415_v59, %v1415_v59 }
 0x23f   :  { %v676_v10 = vsel %vm555_vm2, %v642_v13, 0.0  ;;  %v1444_v21 = vsub.f32 %v1350_v54, %v597_v53  ;;  %v645_v51 = vmul.f32 %v1420_v46, %v1420_v46  ;;  %v646_v34 = vmul.f32 %v1423_v3, %v1423_v3 }
 0x240   :  { %v673_v18 = vadd.f32 %v672_v2, %v639_v43  ;;  %v1441_v14 = vsub.f32 %v1307_v22, %v598_v1  ;;  %v680_v52 = vadd.f32 %v644_v58, %v643_v4  ;;  %v1449_v27 = vsub.f32 %v1311_v24, %v598_v1 }
 0x241   :  { %v586_v15 = vpop.xlane.xlu1 %585  ;;  %v1454_v35 = vsub.f32 %v1309_v23, %v598_v1  ;;  %v647_v22 = vmul.f32 %v1430_v17, %v1430_v17  ;;  %v649_v54 = vmul.f32 %v1433_v7, %v1433_v7  ;;  %v1463_v48 = vsub.f32 %v1313_v25, %v598_v1 }
 0x242   :  { %v599_v28 = vmul.f32 0.0012755102, %v586_v15  ;;  %v674_v33 = vadd.f32 %v673_v18, %v640_v16  ;;  %v681_v40 = vadd.f32 %v680_v52, %v645_v51  ;;  %v650_v41 = vmul.f32 %v1441_v14, %v1441_v14 }
 0x243   :  { %v1466_v53 = vsub.f32 %v1355_v61, %v598_v1  ;;  %v651_v23 = vmul.f32 %v1449_v27, %v1449_v27  ;;  %v648_v60 = vmul.f32 %v1444_v21, %v1444_v21  ;;  %v1473_v13 = vsub.f32 %v1360_v0, %v598_v1 }
 0x244   :  { %v675_v24 = vadd.f32 %v674_v33, %v641_v9  ;;  %v682_v11 = vadd.f32 %v681_v40, %v646_v34  ;;  %v1476_v57 = vsub.f32 %v1357_v62, %v598_v1  ;;  %v652_v25 = vmul.f32 %v1454_v35, %v1454_v35 }
 0x245   :  { %v595_v55 = vpop.xlane.xlu0 %594  ;;  %v689_v61 = vadd.f32 %v651_v23, %v650_v41  ;;  %v1481_v43 = vsub.f32 %v1319_v29, %v599_v28  ;;  %v685_v4 = vsel %vm555_vm2, %v649_v54, 0.0  ;;  %v1485_v16 = vsub.f32 %v1323_v31, %v599_v28 }
 0x246   :  { %v677_v63 = vadd.f32 %v676_v10, %v675_v24  ;;  %v683_v2 = vadd.f32 %v682_v11, %v647_v22  ;;  %v1488_v0 = vsub.f32 %v1321_v30, %v599_v28  ;;  %v600_v58 = vmul.f32 0.0012755102, %v595_v55 }
 0x247   :  { %v653_v62 = vmul.f32 %v1463_v48, %v1463_v48  ;;  %v654_v1 = vmul.f32 %v1466_v53, %v1466_v53  ;;  %v690_v9 = vadd.f32 %v689_v61, %v652_v25  ;;  %v1495_v18 = vsub.f32 %v1325_v32, %v599_v28 }
 0x248   :  { %678 = vadd.xlane.f32.xlu1 %v677_v63  ;;  %v684_v29 = vadd.f32 %v683_v2, %v648_v60  ;;  %v657_v31 = vmul.f32 %v1481_v43, %v1481_v43  ;;  %v658_v30 = vmul.f32 %v1485_v16, %v1485_v16  ;;  %v655_v10 = vmul.f32 %v1473_v13, %v1473_v13 }
 0x249   :  { %v656_v15 = vmul.f32 %v1476_v57, %v1476_v57  ;;  %v691_v51 = vadd.f32 %v690_v9, %v653_v62  ;;  %v1506_v52 = vsub.f32 %v1365_v5, %v599_v28  ;;  %v1509_v32 = vsub.f32 %v1370_v8, %v599_v28 }
 0x24a   :  { %v686_v33 = vadd.f32 %v685_v4, %v684_v29  ;;  %v659_v34 = vmul.f32 %v1488_v0, %v1488_v0  ;;  %v698_v22 = vadd.f32 %v658_v30, %v657_v31  ;;  %v1514_v40 = vsub.f32 %v1367_v6, %v599_v28 }
 0x24b   :  { %v692_v54 = vadd.f32 %v691_v51, %v654_v1  ;;  %v1517_v41 = vsub.f32 %v1331_v36, %v600_v58  ;;  %v1520_v24 = vsub.f32 %v1335_v38, %v600_v58  ;;  %v660_v5 = vmul.f32 %v1495_v18, %v1495_v18 }
 0x24c   :  { %687 = vadd.xlane.f32.xlu0 %v686_v33  ;;  %v699_v8 = vadd.f32 %v698_v22, %v659_v34  ;;  %v1525_v23 = vsub.f32 %v1333_v37, %v600_v58  ;;  %v694_v60 = vsel %vm555_vm2, %v656_v15, 0.0  ;;  %v661_v36 = vmul.f32 %v1506_v52, %v1506_v52  ;;  %v801_v22 = vld [vmem:[%s1653_s6] sm:$0xff] }
 0x24d   :  { %v693_v55 = vadd.f32 %v692_v54, %v655_v10  ;;  %v664_v6 = vmul.f32 %v1517_v41, %v1517_v41  ;;  %v1533_v38 = vsub.f32 %v1337_v39, %v600_v58  ;;  %v665_v11 = vmul.f32 %v1520_v24, %v1520_v24  ;;  %v802_v54 = vld [vmem:[%s1653_s6 + $0x8] sm:$0xff] }
 0x24e   :  { %v700_v28 = vadd.f32 %v699_v8, %v660_v5  ;;  %v662_v37 = vmul.f32 %v1509_v32, %v1509_v32  ;;  %v663_v25 = vmul.f32 %v1514_v40, %v1514_v40  ;;  %v1542_v2 = vsub.f32 %v1375_v19, %v600_v58  ;;  %v803_v5 = vld [vmem:[%s1653_s6 + $0x10] sm:$0xff] }
 0x24f   :  { %v695_v63 = vadd.f32 %v694_v60, %v693_v55  ;;  %v666_v4 = vmul.f32 %v1525_v23, %v1525_v23  ;;  %v707_v62 = vadd.f32 %v665_v11, %v664_v6  ;;  %v1547_v39 = vsub.f32 %v1377_v20, %v600_v58 }
 0x250   :  { %v701_v61 = vadd.f32 %v700_v28, %v661_v36  ;;  %v1550_v9 = vsub.f32 %v1380_v26, %v600_v58  ;;  %v667_v29 = vmul.f32 %v1533_v38, %v1533_v38  ;;  %v703_v30 = vsel %vm555_vm2, %v663_v25, 0.0  ;;  %v731_v25 = vld [vmem:[%s1652_s5] sm:$0xff] }
 0x251   :  { %696 = vadd.xlane.f32.xlu1 %v695_v63  ;;  %v708_v31 = vadd.f32 %v707_v62, %v666_v4  ;;  %v668_v10 = vmul.f32 %v1542_v2, %v1542_v2  ;;  %v670_v51 = vmul.f32 %v1547_v39, %v1547_v39 }
 0x252   :  { %v702_v1 = vadd.f32 %v701_v61, %v662_v37  ;;  %v669_v20 = vmul.f32 %v1550_v9, %v1550_v9 }
 0x253   :  { %v709_v15 = vadd.f32 %v708_v31, %v667_v29  ;;  %v712_v33 = vsel %vm555_vm2, %v670_v51, 0.0  ;;  %v732_v31 = vld [vmem:[%s1652_s5 + $0x8] sm:$0xff]  ;;  %v733_v51 = vld [vmem:[%s1652_s5 + $0x10] sm:$0xff] }
 0x254   :  { %v704_v19 = vadd.f32 %v703_v30, %v702_v1 }
 0x255   :  { %v710_v26 = vadd.f32 %v709_v15, %v668_v10 }
 0x256   :  { %705 = vadd.xlane.f32.xlu0 %v704_v19 }
 0x257   :  { %v711_v58 = vadd.f32 %v710_v26, %v669_v20 }
 0x259   :  { %v713_v34 = vadd.f32 %v712_v33, %v711_v58  ;;  %v734_v33 = vld [vmem:[%s1652_s5 + $0x18] sm:$0xff] }
 0x25b   :  { %714 = vadd.xlane.f32.xlu1 %v713_v34 }
 0x26c   :  { %808 = vperm.xlu0 %1053, %v801_v22   ;;  %813 = vperm.xlu1 %1054, %v802_v54   ;;  %v735_v54 = vld [vmem:[%s1652_s5 + $0x20] sm:$0xff]  ;;  %s1120_s5 = smov [#allocation5]  }
 0x270   :  { %818 = vperm.xlu0 %1053, %v803_v5   ;;  %v805_v5 = vld [vmem:[%s1653_s6 + $0x20] sm:$0xff] }
 0x2d5   :  { %v679_v8 = vpop.xlane.xlu1 %678 }
 0x2d6   :  { %v716_v55 = vmul.f32 0.0012755102, %v679_v8 }
 0x2d8   :  { %v721_v60 = vadd.f32 0.001, %v716_v55 }
 0x2d9   :  { %v688_v6 = vpop.xlane.xlu0 %687 }
 0x2da   :  { %1055 = vrsqrt.f32 %v721_v60  ;;  %v717_v36 = vmul.f32 0.0012755102, %v688_v6  ;;  %v804_v60 = vld [vmem:[%s1653_s6 + $0x18] sm:$0xff]  ;;  %s906_s6 = sshll.u32 %s1120_s5, 4  ;;  %s907_s6 = int_to_ptr.vmem [resolvable:$true] %s906_s6 }
 0x2db   :  { %s1087_s29 = scalar_lea.vmem %s907_s6, 4480  ;;  %p1092_p9 = scmp.lt.s32.totalorder %s907_s6, %s907_s6 }
 0x2dc   :  { %v722_v28 = vadd.f32 0.001, %v717_v36  ;;  %p1088_p8 = scmp.ne.s32.totalorder %s907_s6, %s1087_s29  ;;  %p1093_p10 = scmp.lt.s32.totalorder %s1087_s29, %s1087_s29 }
 0x2de   :  { %1057 = vrsqrt.f32 %v722_v28  ;;  %v697_v11 = vpop.xlane.xlu1 %696  ;;  %p1094_p11 = por %p1093_p10, %p1092_p9 }
 0x2df   :  { %v718_v63 = vmul.f32 0.0012755102, %v697_v11 }
 0x2e0   :  { %p1095_p12 = pnand %p1094_p11, %p1088_p8 }
 0x2e1   :  { %v723_v37 = vadd.f32 0.001, %v718_v63 }
 0x2e3   :  { %1059 = vrsqrt.f32 %v723_v37  ;;  %v706_v4 = vpop.xlane.xlu0 %705 }
 0x2e4   :  { %v1056_v61 = vpop.eup %1055  ;;  %v719_v62 = vmul.f32 0.0012755102, %v706_v4 }
 0x2e5   :  { %v736_v1 = vmul.f32 %v1056_v61, %v731_v25 }
 0x2e6   :  { %v724_v29 = vadd.f32 0.001, %v719_v62 }
 0x2e7   :  { %743 = vperm.xlu0 %1053, %v736_v1  }
 0x2e8   :  { %v1058_v30 = vpop.eup %1057  ;;  %1061 = vrsqrt.f32 %v724_v29  ;;  %v715_v19 = vpop.xlane.xlu1 %714 }
 0x2e9   :  { %v737_v10 = vmul.f32 %v1058_v30, %v732_v31  ;;  %v720_v15 = vmul.f32 0.0012755102, %v715_v19 }
 0x2eb   :  { %748 = vperm.xlu1 %1054, %v737_v10   ;;  %v725_v20 = vadd.f32 0.001, %v720_v15  ;;  %v809_v6 = vpop.permute.xlu0 %808 }
 0x2ec   :  { %v814_v11 = vpop.permute.xlu1 %813 }
 0x2ed   :  { %v1060_v26 = vpop.eup %1059  ;;  %1063 = vrsqrt.f32 %v725_v20 }
 0x2ee   :  { %v738_v58 = vmul.f32 %v1060_v26, %v733_v51 }
 0x2ef   :  { %v819_v36 = vpop.permute.xlu0 %818 }
 0x2f0   :  { %753 = vperm.xlu1 %1054, %v738_v58  }
 0x2f2   :  { %v1062_v34 = vpop.eup %1061 }
 0x2f3   :  { %v739_v22 = vmul.f32 %v1062_v34, %v734_v33 }
 0x2f5   :  { %758 = vperm.xlu0 %1053, %v739_v22  }
 0x2f7   :  { %v1064_v8 = vpop.eup %1063 }
 0x2f8   :  { %v740_v55 = vmul.f32 %v1064_v8, %v735_v54 }
 0x2f9   :  { %828 = vperm.xlu0 %1053, %v805_v5  }
 0x2fa   :  { %763 = vperm.xlu1 %1054, %v740_v55  }
 0x2fe   :  { %823 = vperm.xlu1 %1054, %v804_v60  }
 0x366   :  { %v744_v28 = vpop.permute.xlu0 %743 }
 0x367   :  { %v766_v63 = vmul.f32 %v744_v28, %v1386_v42  ;;  %v767_v37 = vmul.f32 %v744_v28, %v1389_v45  ;;  %v768_v25 = vmul.f32 %v744_v28, %v1392_v47  ;;  %v769_v61 = vmul.f32 %v744_v28, %v1395_v49 }
 0x368   :  { %v770_v4 = vmul.f32 %v744_v28, %v1403_v56  ;;  %v771_v62 = vmul.f32 %v744_v28, %v1405_v12  ;;  %v772_v1 = vmul.f32 %v744_v28, %v1397_v50 }
 0x369   :  { %v831_v29 = vadd.f32 %v809_v6, %v766_v63  ;;  %v832_v31 = vadd.f32 %v809_v6, %v767_v37  ;;  %v833_v30 = vadd.f32 %v809_v6, %v768_v25  ;;  %v834_v19 = vadd.f32 %v809_v6, %v769_v61 }
 0x36a   :  { %v835_v10 = vadd.f32 %v809_v6, %v770_v4  ;;  %v836_v15 = vadd.f32 %v809_v6, %v771_v62  ;;  %v837_v51 = vadd.f32 %v809_v6, %v772_v1  ;;  %v749_v42 = vpop.permute.xlu1 %748 }
 0x36b   :  { %866 = vst [vmem:[#allocation5] sm:$0xff] %v831_v29  ;;  %867 = vst [vmem:[#allocation5 + $0x8] sm:$0xff] %v832_v31  ;;  %v773_v45 = vmul.f32 %v749_v42, %v1412_v44  ;;  %v774_v47 = vmul.f32 %v749_v42, %v1415_v59  ;;  %v775_v49 = vmul.f32 %v749_v42, %v1420_v46 }
 0x36c   :  { %868 = vst [vmem:[#allocation5 + $0x10] sm:$0xff] %v833_v30  ;;  %869 = vst [vmem:[#allocation5 + $0x18] sm:$0xff] %v834_v19  ;;  %v776_v50 = vmul.f32 %v749_v42, %v1423_v3  ;;  %v777_v56 = vmul.f32 %v749_v42, %v1430_v17  ;;  %v778_v12 = vmul.f32 %v749_v42, %v1444_v21 }
 0x36d   :  { %870 = vst [vmem:[#allocation5 + $0x20] sm:$0xff] %v835_v10  ;;  %871 = vst [vmem:[#allocation5 + $0x28] sm:$0xff] %v836_v15  ;;  %v779_v20 = vmul.f32 %v749_v42, %v1433_v7  ;;  %v838_v26 = vadd.f32 %v814_v11, %v773_v45  ;;  %v839_v58 = vadd.f32 %v814_v11, %v774_v47 }
 0x36e   :  { %872 = vst.msk [vmem:[#allocation5 + $0x30] sm:$0xff] %vm555_vm2, %v837_v51  ;;  %v840_v33 = vadd.f32 %v814_v11, %v775_v49  ;;  %v841_v34 = vadd.f32 %v814_v11, %v776_v50  ;;  %v842_v22 = vadd.f32 %v814_v11, %v777_v56  ;;  %v843_v54 = vadd.f32 %v814_v11, %v778_v12 }
 0x36f   :  { %v844_v5 = vadd.f32 %v814_v11, %v779_v20  ;;  %873 = vst [vmem:[#allocation5 + $0x38] sm:$0xff] %v838_v26  ;;  %874 = vst [vmem:[#allocation5 + $0x40] sm:$0xff] %v839_v58  ;;  %v754_v44 = vpop.permute.xlu1 %753 }
 0x370   :  { %875 = vst [vmem:[#allocation5 + $0x48] sm:$0xff] %v840_v33  ;;  %876 = vst [vmem:[#allocation5 + $0x50] sm:$0xff] %v841_v34  ;;  %v780_v59 = vmul.f32 %v754_v44, %v1441_v14  ;;  %v781_v46 = vmul.f32 %v754_v44, %v1449_v27  ;;  %v782_v3 = vmul.f32 %v754_v44, %v1454_v35 }
 0x371   :  { %877 = vst [vmem:[#allocation5 + $0x58] sm:$0xff] %v842_v22  ;;  %878 = vst [vmem:[#allocation5 + $0x60] sm:$0xff] %v843_v54  ;;  %v783_v17 = vmul.f32 %v754_v44, %v1463_v48  ;;  %v784_v7 = vmul.f32 %v754_v44, %v1466_v53  ;;  %v785_v21 = vmul.f32 %v754_v44, %v1473_v13 }
 0x372   :  { %879 = vst.msk [vmem:[#allocation5 + $0x68] sm:$0xff] %vm555_vm2, %v844_v5  ;;  %v786_v8 = vmul.f32 %v754_v44, %v1476_v57  ;;  %v845_v55 = vadd.f32 %v819_v36, %v780_v59  ;;  %v846_v60 = vadd.f32 %v819_v36, %v781_v46  ;;  %v847_v6 = vadd.f32 %v819_v36, %v782_v3 }
 0x373   :  { %v848_v28 = vadd.f32 %v819_v36, %v783_v17  ;;  %v849_v11 = vadd.f32 %v819_v36, %v784_v7  ;;  %v850_v63 = vadd.f32 %v819_v36, %v785_v21 }
 0x374   :  { %v851_v37 = vadd.f32 %v819_v36, %v786_v8  ;;  %880 = vst [vmem:[#allocation5 + $0x70] sm:$0xff] %v845_v55  ;;  %881 = vst [vmem:[#allocation5 + $0x78] sm:$0xff] %v846_v60  ;;  %v759_v14 = vpop.permute.xlu0 %758 }
 0x375   :  { %882 = vst [vmem:[#allocation5 + $0x80] sm:$0xff] %v847_v6  ;;  %883 = vst [vmem:[#allocation5 + $0x88] sm:$0xff] %v848_v28  ;;  %v787_v27 = vmul.f32 %v759_v14, %v1481_v43  ;;  %v788_v48 = vmul.f32 %v759_v14, %v1485_v16  ;;  %v789_v53 = vmul.f32 %v759_v14, %v1488_v0 }
 0x376   :  { %884 = vst [vmem:[#allocation5 + $0x90] sm:$0xff] %v849_v11  ;;  %885 = vst [vmem:[#allocation5 + $0x98] sm:$0xff] %v850_v63  ;;  %v790_v13 = vmul.f32 %v759_v14, %v1495_v18  ;;  %v791_v57 = vmul.f32 %v759_v14, %v1506_v52  ;;  %v792_v0 = vmul.f32 %v759_v14, %v1509_v32 }
 0x377   :  { %886 = vst.msk [vmem:[#allocation5 + $0xa0] sm:$0xff] %vm555_vm2, %v851_v37 }
 0x378   :  { %v829_v1 = vpop.permute.xlu0 %828 }
 0x379   :  { %v764_v35 = vpop.permute.xlu1 %763 }
 0x37a   :  { %v794_v36 = vmul.f32 %v764_v35, %v1517_v41  ;;  %v795_v25 = vmul.f32 %v764_v35, %v1520_v24  ;;  %v796_v61 = vmul.f32 %v764_v35, %v1525_v23  ;;  %v797_v4 = vmul.f32 %v764_v35, %v1533_v38 }
 0x37b   :  { %v798_v62 = vmul.f32 %v764_v35, %v1542_v2  ;;  %v799_v43 = vmul.f32 %v764_v35, %v1550_v9  ;;  %v800_v16 = vmul.f32 %v764_v35, %v1547_v39  ;;  %v793_v38 = vmul.f32 %v759_v14, %v1514_v40 }
 0x37c   :  { %v859_v18 = vadd.f32 %v829_v1, %v794_v36  ;;  %v860_v29 = vadd.f32 %v829_v1, %v795_v25  ;;  %v861_v52 = vadd.f32 %v829_v1, %v796_v61  ;;  %v862_v31 = vadd.f32 %v829_v1, %v797_v4 }
 0x37d   :  { %v863_v41 = vadd.f32 %v829_v1, %v798_v62  ;;  %v864_v24 = vadd.f32 %v829_v1, %v799_v43  ;;  %v865_v23 = vadd.f32 %v829_v1, %v800_v16  ;;  %v824_v30 = vpop.permute.xlu1 %823 }
 0x37e   :  { %894 = vst [vmem:[#allocation5 + $0xe0] sm:$0xff] %v859_v18  ;;  %895 = vst [vmem:[#allocation5 + $0xe8] sm:$0xff] %v860_v29  ;;  %v852_v2 = vadd.f32 %v824_v30, %v787_v27  ;;  %v853_v39 = vadd.f32 %v824_v30, %v788_v48  ;;  %v854_v9 = vadd.f32 %v824_v30, %v789_v53 }
 0x37f   :  { %896 = vst [vmem:[#allocation5 + $0xf0] sm:$0xff] %v861_v52  ;;  %897 = vst [vmem:[#allocation5 + $0xf8] sm:$0xff] %v862_v31  ;;  %v855_v32 = vadd.f32 %v824_v30, %v790_v13  ;;  %v856_v19 = vadd.f32 %v824_v30, %v791_v57  ;;  %v857_v10 = vadd.f32 %v824_v30, %v792_v0 }
 0x380   :  { %898 = vst [vmem:[#allocation5 + $0x100] sm:$0xff] %v863_v41  ;;  %899 = vst [vmem:[#allocation5 + $0x108] sm:$0xff] %v864_v24  ;;  %v858_v15 = vadd.f32 %v824_v30, %v793_v38 }
 0x381   :  { %900 = vst.msk [vmem:[#allocation5 + $0x110] sm:$0xff] %vm555_vm2, %v865_v23  ;;  %887 = vst [vmem:[#allocation5 + $0xa8] sm:$0xff] %v852_v2 }
 0x382   :  { %888 = vst [vmem:[#allocation5 + $0xb0] sm:$0xff] %v853_v39  ;;  %889 = vst [vmem:[#allocation5 + $0xb8] sm:$0xff] %v854_v9 }
 0x383   :  { %890 = vst [vmem:[#allocation5 + $0xc0] sm:$0xff] %v855_v32  ;;  %891 = vst [vmem:[#allocation5 + $0xc8] sm:$0xff] %v856_v19 }
 0x384   :  { %892 = vst [vmem:[#allocation5 + $0xd0] sm:$0xff] %v857_v10  ;;  %893 = vst.msk [vmem:[#allocation5 + $0xd8] sm:$0xff] %vm555_vm2, %v858_v15 }
 0x385   :  { %1098 = shalt.err (!%p1095_p12)
}
 0x386   :  { %s1099_s9 = scalar_lea.hbm %s1654_s7, 4480 }
 0x387   :  { %p1100_p13 = scmp.ne.s32.totalorder %s1654_s7, %s1099_s9  ;;  %p1103_p0 = scmp.lt.u32.totalorder %s1099_s9, %s1654_s7 }
 0x389   :  { %p1105_p1 = pnand %p1103_p0, %p1100_p13 }
 0x38b   :  { %1108 = shalt.err (!%p1105_p1)
}
 0x38c   :  { %912 = dma.vmem_to_hbm [thread:$0]  %s907_s6, 4480, %s1654_s7, [#allocation4], %s1114_s11, %s1114_s11, %s1115_s12  }
 0x38d   :  { %1111 = dma.done.wait [#allocation4], 4480  }
 0x38e   :  { %1112 = vsyncadd [#allocation4], 4294962816 }
 0x38f   :  { %916 = vsyncpa [#allocation3], 1 }
 0x390   :  { %917 = vsyncpa [#allocation4], 1 }

</bundles_post_ra>
